<compile_context>
chip_gen: v7x
topology: tpu7x:2x2x1
jax: 0.10.0
libtpu: 0.0.40
codegen_flags: <defaults>
</compile_context>

<pallas_src>
import jax
import jax.numpy as jnp
from jax.experimental import pallas as pl
from jax.experimental.pallas import tpu as pltpu

# Static gather indices from the PyTorch module: x[1,4], x[3,2], x[5,6].
_STACK_INDICES = ((1, 4), (3, 2), (5, 6))


def _dispatch_threshold_bytes() -> int:
    """Per-generation break-even: below this total selected size, plain
    jnp.stack (fused by XLA) beats the standalone Pallas custom call."""
    try:
        kind = jax.devices()[0].device_kind.lower()
    except Exception:  # no device info available at trace time
        kind = ""
    if "v5" in kind:
        return 128 * 1024      # slower HBM -> Pallas wins earlier only for bigger slabs
    if "v7" in kind:
        return 512 * 1024      # very fast HBM -> copy is cheap, overhead dominates longer
    return 256 * 1024          # v6e / default


def _stack_pallas(x):
    """Zero-VMEM Pallas path: three concurrent HBM->HBM DMAs."""
    n_sel = len(_STACK_INDICES)
    D0, D1, H, W = x.shape

    def kernel(x_hbm, o_hbm, sems):
        # All three slab copies in flight concurrently; each slab is the
        # contiguous trailing (H, W) region -> one descriptor per copy.
        copies = [
            pltpu.make_async_copy(x_hbm.at[d0, d1], o_hbm.at[k], sems.at[k])
            for k, (d0, d1) in enumerate(_STACK_INDICES)
        ]
        for c in copies:
            c.start()
        for c in copies:
            c.wait()

    return pl.pallas_call(
        kernel,
        out_shape=jax.ShapeDtypeStruct((n_sel, H, W), x.dtype),
        in_specs=[pl.BlockSpec(memory_space=pl.ANY)],
        out_specs=pl.BlockSpec(memory_space=pl.ANY),
        scratch_shapes=[pltpu.SemaphoreType.DMA((n_sel,))],
        cost_estimate=pl.CostEstimate(
            flops=0,
            transcendentals=0,
            bytes_accessed=2 * n_sel * H * W * x.dtype.itemsize,
        ),
    )(x)


def stack_model_forward(x, *, force_pallas=False):
    """StackModel.forward: z[k] = x[_STACK_INDICES[k]], shape (3, H, W).

    x: (D0, D1, H, W) array with D0 >= 6, D1 >= 7.
    """
    if x.ndim < 2:
        raise ValueError(f"StackModel expects x.ndim >= 2, got shape {x.shape}")
    D0, D1 = x.shape[0], x.shape[1]
    max_d0 = max(i for i, _ in _STACK_INDICES)
    max_d1 = max(j for _, j in _STACK_INDICES)
    # Trace-time guard: never bake an out-of-bounds source index into a DMA.
    if D0 <= max_d0 or D1 <= max_d1:
        raise ValueError(
            f"StackModel requires x.shape[0] > {max_d0} and x.shape[1] > {max_d1}, "
            f"got {x.shape}")

    n_sel = len(_STACK_INDICES)
    slab_bytes = 1
    for d in x.shape[2:]:
        slab_bytes *= d
    slab_bytes *= x.dtype.itemsize
    total_bytes = n_sel * slab_bytes

    if force_pallas or (x.ndim == 4 and total_bytes >= _dispatch_threshold_bytes()):
        return _stack_pallas(x)

    # Small-slab (or non-4D) path: let XLA fuse the slice+concat into the
    # consumer — several microseconds cheaper than a standalone custom call.
    return jnp.stack([x[d0, d1] for d0, d1 in _STACK_INDICES])


if __name__ == "__main__":
    key = jax.random.PRNGKey(0)
    # Small shape consistent with the module: first two dims must cover
    # indices (1,4), (3,2), (5,6) -> need D0 >= 6, D1 >= 7.
    D0, D1, H, W = 8, 8, 8, 128
    x = jax.random.normal(key, (D0, D1, H, W), dtype=jnp.float32)

    z_ref = jnp.stack([x[1, 4], x[3, 2], x[5, 6]])

    # 1) Production wrapper (size-based dispatch — picks the fused XLA path
    #    at this small size).
    z_dispatch = jax.block_until_ready(stack_model_forward(x))
    assert z_dispatch.shape == (3, H, W)
    assert jnp.array_equal(z_dispatch, z_ref)

    # 2) Force the Pallas HBM->HBM DMA kernel to exercise it on TPU.
    z_pallas = jax.block_until_ready(stack_model_forward(x, force_pallas=True))
    assert z_pallas.shape == (3, H, W)
    assert jnp.array_equal(z_pallas, z_ref)

    print("KERNEL_OK")
</pallas_src>

<mosaic_0001>
module attributes {stable_mosaic.version = 11 : i64} {
  func.func @kernel(%arg0: memref<8x8x8x128xf32, #tpu.memory_space<any>>, %arg1: memref<3x8x128xf32, #tpu.memory_space<any>>, %arg2: memref<3x!tpu.dma_semaphore, #tpu.memory_space<semaphore_mem>>) attributes {dimension_semantics = [], scalar_prefetch = 0 : i64, scratch_operands = 1 : i64, tpu.core_type = #tpu.core_type<tc>} {
    %c1_i32 = arith.constant 1 : i32
    %c4_i32 = arith.constant 4 : i32
    %c0_i32 = arith.constant 0 : i32
    %c0_i32_0 = arith.constant 0 : i32
    %c0_i32_1 = arith.constant 0 : i32
    %c0_i32_2 = arith.constant 0 : i32
    %0 = tpu.memref_slice %arg0[%c1_i32, %c4_i32, %c0_i32_1, %c0_i32_2] : memref<8x8x8x128xf32, #tpu.memory_space<any>> -> memref<1x1x8x128xf32, #tpu.memory_space<any>>
    %1 = tpu.memref_squeeze %0 : memref<1x1x8x128xf32, #tpu.memory_space<any>> -> memref<8x128xf32, #tpu.memory_space<any>>
    %c0_i32_3 = arith.constant 0 : i32
    %c0_i32_4 = arith.constant 0 : i32
    %2 = tpu.memref_slice %arg1[%c0_i32, %c0_i32_3, %c0_i32_4] : memref<3x8x128xf32, #tpu.memory_space<any>> -> memref<1x8x128xf32, #tpu.memory_space<any>>
    %3 = tpu.memref_squeeze %2 : memref<1x8x128xf32, #tpu.memory_space<any>> -> memref<8x128xf32, #tpu.memory_space<any>>
    %4 = tpu.memref_slice %arg2[%c0_i32_0] : memref<3x!tpu.dma_semaphore, #tpu.memory_space<semaphore_mem>> -> memref<1x!tpu.dma_semaphore, #tpu.memory_space<semaphore_mem>>
    %5 = tpu.memref_squeeze %4 : memref<1x!tpu.dma_semaphore, #tpu.memory_space<semaphore_mem>> -> memref<!tpu.dma_semaphore, #tpu.memory_space<semaphore_mem>>
    tpu.enqueue_dma source(%1 : memref<8x128xf32, #tpu.memory_space<any>>) target(%3 : memref<8x128xf32, #tpu.memory_space<any>>) target_semaphore(%5 : memref<!tpu.dma_semaphore, #tpu.memory_space<semaphore_mem>>)
    %c3_i32 = arith.constant 3 : i32
    %c2_i32 = arith.constant 2 : i32
    %c1_i32_5 = arith.constant 1 : i32
    %c1_i32_6 = arith.constant 1 : i32
    %c0_i32_7 = arith.constant 0 : i32
    %c0_i32_8 = arith.constant 0 : i32
    %6 = tpu.memref_slice %arg0[%c3_i32, %c2_i32, %c0_i32_7, %c0_i32_8] : memref<8x8x8x128xf32, #tpu.memory_space<any>> -> memref<1x1x8x128xf32, #tpu.memory_space<any>>
    %7 = tpu.memref_squeeze %6 : memref<1x1x8x128xf32, #tpu.memory_space<any>> -> memref<8x128xf32, #tpu.memory_space<any>>
    %c0_i32_9 = arith.constant 0 : i32
    %c0_i32_10 = arith.constant 0 : i32
    %8 = tpu.memref_slice %arg1[%c1_i32_5, %c0_i32_9, %c0_i32_10] : memref<3x8x128xf32, #tpu.memory_space<any>> -> memref<1x8x128xf32, #tpu.memory_space<any>>
    %9 = tpu.memref_squeeze %8 : memref<1x8x128xf32, #tpu.memory_space<any>> -> memref<8x128xf32, #tpu.memory_space<any>>
    %10 = tpu.memref_slice %arg2[%c1_i32_6] : memref<3x!tpu.dma_semaphore, #tpu.memory_space<semaphore_mem>> -> memref<1x!tpu.dma_semaphore, #tpu.memory_space<semaphore_mem>>
    %11 = tpu.memref_squeeze %10 : memref<1x!tpu.dma_semaphore, #tpu.memory_space<semaphore_mem>> -> memref<!tpu.dma_semaphore, #tpu.memory_space<semaphore_mem>>
    tpu.enqueue_dma source(%7 : memref<8x128xf32, #tpu.memory_space<any>>) target(%9 : memref<8x128xf32, #tpu.memory_space<any>>) target_semaphore(%11 : memref<!tpu.dma_semaphore, #tpu.memory_space<semaphore_mem>>)
    %c5_i32 = arith.constant 5 : i32
    %c6_i32 = arith.constant 6 : i32
    %c2_i32_11 = arith.constant 2 : i32
    %c2_i32_12 = arith.constant 2 : i32
    %c0_i32_13 = arith.constant 0 : i32
    %c0_i32_14 = arith.constant 0 : i32
    %12 = tpu.memref_slice %arg0[%c5_i32, %c6_i32, %c0_i32_13, %c0_i32_14] : memref<8x8x8x128xf32, #tpu.memory_space<any>> -> memref<1x1x8x128xf32, #tpu.memory_space<any>>
    %13 = tpu.memref_squeeze %12 : memref<1x1x8x128xf32, #tpu.memory_space<any>> -> memref<8x128xf32, #tpu.memory_space<any>>
    %c0_i32_15 = arith.constant 0 : i32
    %c0_i32_16 = arith.constant 0 : i32
    %14 = tpu.memref_slice %arg1[%c2_i32_11, %c0_i32_15, %c0_i32_16] : memref<3x8x128xf32, #tpu.memory_space<any>> -> memref<1x8x128xf32, #tpu.memory_space<any>>
    %15 = tpu.memref_squeeze %14 : memref<1x8x128xf32, #tpu.memory_space<any>> -> memref<8x128xf32, #tpu.memory_space<any>>
    %16 = tpu.memref_slice %arg2[%c2_i32_12] : memref<3x!tpu.dma_semaphore, #tpu.memory_space<semaphore_mem>> -> memref<1x!tpu.dma_semaphore, #tpu.memory_space<semaphore_mem>>
    %17 = tpu.memref_squeeze %16 : memref<1x!tpu.dma_semaphore, #tpu.memory_space<semaphore_mem>> -> memref<!tpu.dma_semaphore, #tpu.memory_space<semaphore_mem>>
    tpu.enqueue_dma source(%13 : memref<8x128xf32, #tpu.memory_space<any>>) target(%15 : memref<8x128xf32, #tpu.memory_space<any>>) target_semaphore(%17 : memref<!tpu.dma_semaphore, #tpu.memory_space<semaphore_mem>>)
    %c1_i32_17 = arith.constant 1 : i32
    %c4_i32_18 = arith.constant 4 : i32
    %c0_i32_19 = arith.constant 0 : i32
    %c0_i32_20 = arith.constant 0 : i32
    %c0_i32_21 = arith.constant 0 : i32
    %c0_i32_22 = arith.constant 0 : i32
    %18 = tpu.memref_slice %arg0[%c1_i32_17, %c4_i32_18, %c0_i32_21, %c0_i32_22] : memref<8x8x8x128xf32, #tpu.memory_space<any>> -> memref<1x1x8x128xf32, #tpu.memory_space<any>>
    %19 = tpu.memref_squeeze %18 : memref<1x1x8x128xf32, #tpu.memory_space<any>> -> memref<8x128xf32, #tpu.memory_space<any>>
    %c0_i32_23 = arith.constant 0 : i32
    %c0_i32_24 = arith.constant 0 : i32
    %20 = tpu.memref_slice %arg1[%c0_i32_19, %c0_i32_23, %c0_i32_24] : memref<3x8x128xf32, #tpu.memory_space<any>> -> memref<1x8x128xf32, #tpu.memory_space<any>>
    %21 = tpu.memref_squeeze %20 : memref<1x8x128xf32, #tpu.memory_space<any>> -> memref<8x128xf32, #tpu.memory_space<any>>
    %22 = tpu.memref_slice %arg2[%c0_i32_20] : memref<3x!tpu.dma_semaphore, #tpu.memory_space<semaphore_mem>> -> memref<1x!tpu.dma_semaphore, #tpu.memory_space<semaphore_mem>>
    %23 = tpu.memref_squeeze %22 : memref<1x!tpu.dma_semaphore, #tpu.memory_space<semaphore_mem>> -> memref<!tpu.dma_semaphore, #tpu.memory_space<semaphore_mem>>
    tpu.wait_dma2 semaphore(%23 : memref<!tpu.dma_semaphore, #tpu.memory_space<semaphore_mem>>) src(%19 : memref<8x128xf32, #tpu.memory_space<any>>) dst(%21 : memref<8x128xf32, #tpu.memory_space<any>>)
    %c3_i32_25 = arith.constant 3 : i32
    %c2_i32_26 = arith.constant 2 : i32
    %c1_i32_27 = arith.constant 1 : i32
    %c1_i32_28 = arith.constant 1 : i32
    %c0_i32_29 = arith.constant 0 : i32
    %c0_i32_30 = arith.constant 0 : i32
    %24 = tpu.memref_slice %arg0[%c3_i32_25, %c2_i32_26, %c0_i32_29, %c0_i32_30] : memref<8x8x8x128xf32, #tpu.memory_space<any>> -> memref<1x1x8x128xf32, #tpu.memory_space<any>>
    %25 = tpu.memref_squeeze %24 : memref<1x1x8x128xf32, #tpu.memory_space<any>> -> memref<8x128xf32, #tpu.memory_space<any>>
    %c0_i32_31 = arith.constant 0 : i32
    %c0_i32_32 = arith.constant 0 : i32
    %26 = tpu.memref_slice %arg1[%c1_i32_27, %c0_i32_31, %c0_i32_32] : memref<3x8x128xf32, #tpu.memory_space<any>> -> memref<1x8x128xf32, #tpu.memory_space<any>>
    %27 = tpu.memref_squeeze %26 : memref<1x8x128xf32, #tpu.memory_space<any>> -> memref<8x128xf32, #tpu.memory_space<any>>
    %28 = tpu.memref_slice %arg2[%c1_i32_28] : memref<3x!tpu.dma_semaphore, #tpu.memory_space<semaphore_mem>> -> memref<1x!tpu.dma_semaphore, #tpu.memory_space<semaphore_mem>>
    %29 = tpu.memref_squeeze %28 : memref<1x!tpu.dma_semaphore, #tpu.memory_space<semaphore_mem>> -> memref<!tpu.dma_semaphore, #tpu.memory_space<semaphore_mem>>
    tpu.wait_dma2 semaphore(%29 : memref<!tpu.dma_semaphore, #tpu.memory_space<semaphore_mem>>) src(%25 : memref<8x128xf32, #tpu.memory_space<any>>) dst(%27 : memref<8x128xf32, #tpu.memory_space<any>>)
    %c5_i32_33 = arith.constant 5 : i32
    %c6_i32_34 = arith.constant 6 : i32
    %c2_i32_35 = arith.constant 2 : i32
    %c2_i32_36 = arith.constant 2 : i32
    %c0_i32_37 = arith.constant 0 : i32
    %c0_i32_38 = arith.constant 0 : i32
    %30 = tpu.memref_slice %arg0[%c5_i32_33, %c6_i32_34, %c0_i32_37, %c0_i32_38] : memref<8x8x8x128xf32, #tpu.memory_space<any>> -> memref<1x1x8x128xf32, #tpu.memory_space<any>>
    %31 = tpu.memref_squeeze %30 : memref<1x1x8x128xf32, #tpu.memory_space<any>> -> memref<8x128xf32, #tpu.memory_space<any>>
    %c0_i32_39 = arith.constant 0 : i32
    %c0_i32_40 = arith.constant 0 : i32
    %32 = tpu.memref_slice %arg1[%c2_i32_35, %c0_i32_39, %c0_i32_40] : memref<3x8x128xf32, #tpu.memory_space<any>> -> memref<1x8x128xf32, #tpu.memory_space<any>>
    %33 = tpu.memref_squeeze %32 : memref<1x8x128xf32, #tpu.memory_space<any>> -> memref<8x128xf32, #tpu.memory_space<any>>
    %34 = tpu.memref_slice %arg2[%c2_i32_36] : memref<3x!tpu.dma_semaphore, #tpu.memory_space<semaphore_mem>> -> memref<1x!tpu.dma_semaphore, #tpu.memory_space<semaphore_mem>>
    %35 = tpu.memref_squeeze %34 : memref<1x!tpu.dma_semaphore, #tpu.memory_space<semaphore_mem>> -> memref<!tpu.dma_semaphore, #tpu.memory_space<semaphore_mem>>
    tpu.wait_dma2 semaphore(%35 : memref<!tpu.dma_semaphore, #tpu.memory_space<semaphore_mem>>) src(%31 : memref<8x128xf32, #tpu.memory_space<any>>) dst(%33 : memref<8x128xf32, #tpu.memory_space<any>>)
    return
  }
}

</mosaic_0001>

<bundles_post_ra>
// kernel: tpu_custom_call.1
= control target key start
LH: loop header
LB: loop body
LE: loop exit
PB: predicated region body
PF: predicated region fallthrough
CT: control target
= control target key end

     0   :  { %s95_s9 = smov [#allocation2]   ;;  %s96_s10 = smov [#allocation3]   ;;  %s130_s0 = inlined_call_operand.hbm [shape: f32[8,8,8,128], index: 0, kind: input, shape index: {}]   ;;  %s131_s1 = inlined_call_operand.hbm [shape: f32[3,8,128], index: 1, kind: output, shape index: {}]  }
   0x1   :  { %s6_s8 = scalar_lea.hbm %s130_s0, 1536  ;;  %s97_s11 = smov 0  }
   0x2   :  { %19 = dma.general %s6_s8, 128, %s131_s1, %s95_s9, %s96_s10, [#allocation4], %s97_s11, 0  }
   0x3   :  { %s21_s16 = scalar_lea.hbm %s131_s1, 128  ;;  %s37_s19 = scalar_lea.hbm %s131_s1, 256 }
   0x4   :  { %s20_s22 = scalar_lea.hbm %s130_s0, 3328  ;;  %s36_s25 = scalar_lea.hbm %s130_s0, 5888 }
   0x5   :  { %s98_s26 = smov [#allocation2 + $0x1]   ;;  %s99_s27 = smov [#allocation5]  }
   0x6   :  { %35 = dma.general %s20_s22, 128, %s21_s16, %s98_s26, %s99_s27, [#allocation6], %s97_s11, 0  }
   0x7   :  { %s100_s28 = smov [#allocation2 + $0x2]   ;;  %s101_s29 = smov [#allocation7]  }
   0x8   :  { %51 = dma.general %s36_s25, 128, %s37_s19, %s100_s28, %s101_s29, [#allocation8], %s97_s11, 0  }
   0x9   :  { %89 = dma.done.wait [#allocation2], 128 }
   0xa   :  { %90 = vsyncadd [#allocation2], 4294967168 }
   0xb   :  { %91 = dma.done.wait [#allocation2 + $0x1], 128 }
   0xc   :  { %92 = vsyncadd [#allocation2 + $0x1], 4294967168 }
   0xd   :  { %93 = dma.done.wait [#allocation2 + $0x2], 128 }
   0xe   :  { %94 = vsyncadd [#allocation2 + $0x2], 4294967168 }
   0xf   :  { %59 = vsyncmov [#allocation2] }
  0x12   :  { %s60_s1 = vpop.sfrf %59 }
  0x13   :  { %p79_p0 = scmp.ne.s32.totalorder %s60_s1, 0 }
  0x15   :  { %64 = shalt.err (%p79_p0)  }
  0x16   :  { %66 = vsyncmov [#allocation2 + $0x1] }
  0x19   :  { %s67_s30 = vpop.sfrf %66 }
  0x1a   :  { %p80_p1 = scmp.ne.s32.totalorder %s67_s30, 0 }
  0x1c   :  { %71 = shalt.err (%p80_p1)  }
  0x1d   :  { %73 = vsyncmov [#allocation2 + $0x2] }
  0x20   :  { %s74_s0 = vpop.sfrf %73 }
  0x21   :  { %p81_p2 = scmp.ne.s32.totalorder %s74_s0, 0 }
  0x23   :  { %78 = shalt.err (%p81_p2)  }

</bundles_post_ra>
